<compile_context>
chip_gen: v5e
topology: v5e:2x2
jax: 0.10.0
libtpu: 0.0.40
codegen_flags: <defaults>
</compile_context>

<pallas_src>
import functools

import jax
import jax.numpy as jnp
from jax.experimental import pallas as pl
from jax.experimental.pallas import tpu as pltpu

_LANE = 128


def _round_up(n, m):
    return ((n + m - 1) // m) * m


def _cln_kernel(x_ref, g_ref, b_ref, o_ref, *, eps):
    # x_ref / o_ref: (TB, C, TILE_L)  — channels on sublanes, spatial lane-dense.
    # g_ref / b_ref: (C, 1)           — broadcast over batch and spatial lanes.
    x = x_ref[...].astype(jnp.float32)                     # (TB, C, TILE_L)
    c = x.shape[1]
    mean = jnp.mean(x, axis=1, keepdims=True)              # sublane reduce (XLU)
    diff = x - mean
    # torch.std defaults to the unbiased estimator (divide by C - 1); eps is
    # added to the std, not the variance.  C == 1 yields nan, same as torch.
    var = jnp.sum(diff * diff, axis=1, keepdims=True) / jnp.float32(c - 1)
    # Reciprocal lands on the EUP slot (otherwise idle); exact keeps 1e-5
    # parity with the torch reference.
    inv = pl.reciprocal(jnp.sqrt(var) + eps, approx=False)
    y = diff * inv
    gamma = g_ref[...].astype(jnp.float32)                 # (C, 1) -> broadcasts
    beta = b_ref[...].astype(jnp.float32)                  # (C, 1)
    o_ref[...] = (y * gamma + beta).astype(o_ref.dtype)


def _choose_tiles(n_batch, length, channels, dtype_bytes,
                  target_block_bytes=1 << 20):
    """Pick (TB, TILE_L) so one block is ~target_block_bytes.

    Large L  -> TB = 1, TILE_L a multiple of 128 (lane-dense spatial tiling).
    Small L  -> TILE_L = L (full dim, no 128 constraint) and tile over batch.
    """
    row_bytes = max(1, channels * dtype_bytes)
    if length * row_bytes <= target_block_bytes:
        tile_l = length                                    # full spatial extent
        tb = max(1, min(n_batch, target_block_bytes // (length * row_bytes)))
    else:
        tb = 1
        tile_l = max(_LANE, (target_block_bytes // row_bytes) // _LANE * _LANE)
        tile_l = min(tile_l, length) if tile_l >= length else tile_l
    # Keep at least 2 grid steps when possible so both v7x TensorCores get work.
    if pl.cdiv(n_batch, tb) * pl.cdiv(length, tile_l) < 2:
        if tb > 1:
            tb = max(1, tb // 2)
        elif tile_l == length and length > _LANE:
            tile_l = max(_LANE, _round_up(pl.cdiv(length, 2), _LANE))
    return tb, tile_l


def channel_layer_norm(x, gamma, beta, eps=1e-5):
    """x: (B, C, *spatial) channels-first, gamma/beta: (C,). Returns same shape."""
    B, C = x.shape[0], x.shape[1]
    L = 1
    for d in x.shape[2:]:
        L *= d
    dtype_bytes = jnp.dtype(x.dtype).itemsize

    tb, tile_l = _choose_tiles(B, L, C, dtype_bytes)

    x3 = x.reshape(B, C, L)                                # free contiguous view
    gamma2d = gamma.reshape(C, 1)
    beta2d = beta.reshape(C, 1)

    grid = (pl.cdiv(B, tb), pl.cdiv(L, tile_l))
    block_in = tb * C * tile_l * dtype_bytes
    block_f32 = tb * C * tile_l * 4
    # in + out double-buffered + f32 temporaries + params, with slack; explicit
    # so v5e's 16 MiB scoped default never caps pipeline depth, capped well
    # below v7x's 64 MiB physical VMEM.
    vmem_limit = int(min(48 << 20,
                         max(16 << 20, 4 * block_in + 6 * block_f32 + (2 << 20))))

    out3 = pl.pallas_call(
        functools.partial(_cln_kernel, eps=eps),
        out_shape=jax.ShapeDtypeStruct((B, C, L), x.dtype),
        grid_spec=pltpu.PrefetchScalarGridSpec(
            num_scalar_prefetch=0,
            grid=grid,
            in_specs=[
                pl.BlockSpec((tb, C, tile_l), lambda bi, si: (bi, 0, si)),
                pl.BlockSpec((C, 1), lambda bi, si: (0, 0)),
                pl.BlockSpec((C, 1), lambda bi, si: (0, 0)),
            ],
            out_specs=pl.BlockSpec((tb, C, tile_l), lambda bi, si: (bi, 0, si)),
        ),
        compiler_params=pltpu.CompilerParams(
            dimension_semantics=("parallel", "parallel"),
            vmem_limit_bytes=vmem_limit,
        ),
    )(x3, gamma2d, beta2d)

    return out3.reshape(x.shape)


def channel_layer_norm_ref(x, gamma, beta, eps=1e-5):
    """Pure-JAX reference mirroring the PyTorch forward exactly."""
    xl = jnp.moveaxis(x, 1, -1).astype(jnp.float32)        # b c ... -> b ... c
    mean = jnp.mean(xl, axis=-1, keepdims=True)
    std = jnp.std(xl, axis=-1, keepdims=True, ddof=1)      # unbiased, like torch.std
    y = (xl - mean) / (std + eps)
    y = y * gamma + beta
    return jnp.moveaxis(y, -1, 1).astype(x.dtype)          # b ... c -> b c ...


if __name__ == "__main__":
    key = jax.random.PRNGKey(0)
    B, C, H, W = 2, 4, 16, 16
    kx, k2, _ = jax.random.split(key, 3)
    x = jax.random.normal(kx, (B, C, H, W), dtype=jnp.float32)

    # Deterministic, non-trivial affine params to exercise the gamma/beta path.
    gamma = 1.0 + 0.1 * jnp.arange(C, dtype=jnp.float32)
    beta = 0.05 * jnp.arange(C, dtype=jnp.float32)

    out = jax.block_until_ready(channel_layer_norm(x, gamma, beta))
    ref = channel_layer_norm_ref(x, gamma, beta)
    assert out.shape == (B, C, H, W)
    assert jnp.allclose(out, ref, atol=1e-5, rtol=1e-5), "mismatch vs reference"

    # Exercise the boundary-block path (H*W not a multiple of 128, odd shapes).
    x2 = jax.random.normal(k2, (B, C, 5, 7), dtype=jnp.float32)
    out2 = jax.block_until_ready(channel_layer_norm(x2, gamma, beta))
    ref2 = channel_layer_norm_ref(x2, gamma, beta)
    assert out2.shape == (B, C, 5, 7)
    assert jnp.allclose(out2, ref2, atol=1e-5, rtol=1e-5), "mismatch (boundary path)"

    # Exercise the lane-tiled (large spatial) path with a non-128-multiple L.
    x3 = jax.random.normal(k2, (1, C, 300, 3), dtype=jnp.float32)
    out3 = jax.block_until_ready(channel_layer_norm(x3, gamma, beta))
    ref3 = channel_layer_norm_ref(x3, gamma, beta)
    assert jnp.allclose(out3, ref3, atol=1e-5, rtol=1e-5), "mismatch (tiled path)"

    print("KERNEL_OK")
</pallas_src>

<mosaic_0001>
module attributes {stable_mosaic.version = 11 : i64} {
  func.func @_cln_kernel(%arg0: i32, %arg1: i32, %arg2: memref<1x4x256xf32, #tpu.memory_space<vmem>>, %arg3: memref<4x1xf32, #tpu.memory_space<vmem>>, %arg4: memref<4x1xf32, #tpu.memory_space<vmem>>, %arg5: memref<1x4x256xf32, #tpu.memory_space<vmem>>) attributes {dimension_semantics = [#tpu.dimension_semantics<parallel>, #tpu.dimension_semantics<parallel>], iteration_bounds = array<i64: 2, 1>, scalar_prefetch = 0 : i64, scratch_operands = 0 : i64, tpu.core_type = #tpu.core_type<tc>, window_params = [{transform_indices = @transform_0, window_bounds = array<i64: 1, 4, 256>}, {pipeline_mode = #tpu.pipeline_mode<synchronous>, transform_indices = @transform_1, window_bounds = array<i64: 4, 1>}, {pipeline_mode = #tpu.pipeline_mode<synchronous>, transform_indices = @transform_2, window_bounds = array<i64: 4, 1>}, {transform_indices = @transform_3, window_bounds = array<i64: 1, 4, 256>}]} {
    %c0 = arith.constant 0 : index
    %c0_0 = arith.constant 0 : index
    %c0_1 = arith.constant 0 : index
    %0 = vector.load %arg2[%c0, %c0_0, %c0_1] : memref<1x4x256xf32, #tpu.memory_space<vmem>>, vector<1x4x256xf32>
    %cst = arith.constant dense<0.000000e+00> : vector<1x256xf32>
    %1 = vector.multi_reduction <add>, %0, %cst [1] : vector<1x4x256xf32> to vector<1x256xf32>
    %2 = vector.shape_cast %1 : vector<1x256xf32> to vector<1x1x256xf32>
    %cst_2 = arith.constant 4.000000e+00 : f32
    %3 = vector.broadcast %cst_2 : f32 to vector<1x1x256xf32>
    %4 = arith.divf %2, %3 : vector<1x1x256xf32>
    %5 = vector.broadcast %4 : vector<1x1x256xf32> to vector<1x4x256xf32>
    %6 = arith.subf %0, %5 : vector<1x4x256xf32>
    %7 = arith.mulf %6, %6 : vector<1x4x256xf32>
    %cst_3 = arith.constant dense<0.000000e+00> : vector<1x256xf32>
    %8 = vector.multi_reduction <add>, %7, %cst_3 [1] : vector<1x4x256xf32> to vector<1x256xf32>
    %9 = vector.shape_cast %8 : vector<1x256xf32> to vector<1x1x256xf32>
    %cst_4 = arith.constant 3.000000e+00 : f32
    %10 = vector.broadcast %cst_4 : f32 to vector<1x1x256xf32>
    %11 = arith.divf %9, %10 : vector<1x1x256xf32>
    %12 = math.sqrt %11 : vector<1x1x256xf32>
    %cst_5 = arith.constant 9.99999974E-6 : f32
    %13 = vector.broadcast %cst_5 : f32 to vector<1x1x256xf32>
    %14 = arith.addf %12, %13 : vector<1x1x256xf32>
    %15 = tpu.reciprocal %14 : vector<1x1x256xf32> -> vector<1x1x256xf32>
    %16 = vector.broadcast %15 : vector<1x1x256xf32> to vector<1x4x256xf32>
    %17 = arith.mulf %6, %16 : vector<1x4x256xf32>
    %c0_6 = arith.constant 0 : index
    %c0_7 = arith.constant 0 : index
    %18 = vector.load %arg3[%c0_6, %c0_7] : memref<4x1xf32, #tpu.memory_space<vmem>>, vector<4x1xf32>
    %c0_8 = arith.constant 0 : index
    %c0_9 = arith.constant 0 : index
    %19 = vector.load %arg4[%c0_8, %c0_9] : memref<4x1xf32, #tpu.memory_space<vmem>>, vector<4x1xf32>
    %20 = vector.shape_cast %18 : vector<4x1xf32> to vector<1x4x1xf32>
    %21 = vector.broadcast %20 : vector<1x4x1xf32> to vector<1x4x256xf32>
    %22 = arith.mulf %17, %21 : vector<1x4x256xf32>
    %23 = vector.shape_cast %19 : vector<4x1xf32> to vector<1x4x1xf32>
    %24 = vector.broadcast %23 : vector<1x4x1xf32> to vector<1x4x256xf32>
    %25 = arith.addf %22, %24 : vector<1x4x256xf32>
    %c0_10 = arith.constant 0 : index
    %c0_11 = arith.constant 0 : index
    %c0_12 = arith.constant 0 : index
    %26 = vector.load %arg5[%c0_10, %c0_11, %c0_12] : memref<1x4x256xf32, #tpu.memory_space<vmem>>, vector<1x4x256xf32>
    tpu.vector_store %arg5[%c0_10, %c0_11, %c0_12], %25 {strides = array<i32>} : memref<1x4x256xf32, #tpu.memory_space<vmem>>, vector<1x4x256xf32>,
    return
  }
  func.func @transform_0(%arg0: i32, %arg1: i32) -> (i32, i32, i32) {
    %c0_i32 = arith.constant 0 : i32
    %c0_i32_0 = arith.constant 0 : i32
    return %arg0, %c0_i32, %arg1 : i32, i32, i32
  }
  func.func @transform_1(%arg0: i32, %arg1: i32) -> (i32, i32) {
    %c0_i32 = arith.constant 0 : i32
    %c0_i32_0 = arith.constant 0 : i32
    %c0_i32_1 = arith.constant 0 : i32
    return %c0_i32, %c0_i32_0 : i32, i32
  }
  func.func @transform_2(%arg0: i32, %arg1: i32) -> (i32, i32) {
    %c0_i32 = arith.constant 0 : i32
    %c0_i32_0 = arith.constant 0 : i32
    %c0_i32_1 = arith.constant 0 : i32
    return %c0_i32, %c0_i32_0 : i32, i32
  }
  func.func @transform_3(%arg0: i32, %arg1: i32) -> (i32, i32, i32) {
    %c0_i32 = arith.constant 0 : i32
    %c0_i32_0 = arith.constant 0 : i32
    return %arg0, %c0_i32, %arg1 : i32, i32, i32
  }
}

</mosaic_0001>

<bundles_post_ra>
// kernel: tpu_custom_call.1
= control target key start
LH: loop header
LB: loop body
LE: loop exit
PB: predicated region body
PF: predicated region fallthrough
CT: control target
= control target key end

     0   :  { %8 = vsyncpa [#allocation3], 0  ;;  %s837_s0 = inlined_call_operand.hbm [shape: f32[2,4,256], index: 0, kind: input, shape index: {}]   ;;  %s838_s1 = inlined_call_operand.vmem [shape: f32[4,1], index: 1, kind: input, shape index: {}]   ;;  %s839_s2 = inlined_call_operand.vmem [shape: f32[4,1], index: 2, kind: input, shape index: {}]   ;;  %s840_s3 = inlined_call_operand.hbm [shape: f32[2,4,256], index: 3, kind: output, shape index: {}]  }
   0x1   :  { %10 = vsyncpa [#allocation3 + $0x1], 0 }
   0x2   :  { %11 = vsyncpa [#allocation4], 0 }
   0x3   :  { %13 = vsyncpa [#allocation4 + $0x1], 0  ;;  %s696_s12 = smov 0   ;;  %s698_s13 = smov 0  }
   0x4   :  { %s700_s14 = smov 0   ;;  %s702_s15 = smov 0  }
   0x5   :  { %s704_s16 = smov 0   ;;  %s706_s17 = smov 0  }
   0x6 LB: > { %s462_s18 = sadd.s32 4294967295, %s670_s17   ;;  %s463_s19 = sadd.s32 4294967294, %s670_s17   ;;  %s670_s17 = sphi %s706_s17, %s19_s17   ;;  %s666_s16 = sphi %s704_s16, %s849_s16   ;;  %s662_s15 = sphi %s702_s15, %s848_s15   ;;  %s658_s14 = sphi %s700_s14, %s847_s14   ;;  %s654_s13 = sphi %s698_s13, %s846_s13   ;;  %s650_s12 = sphi %s696_s12, %s845_s12  }
   0x7   : > { %s31_s20 = sadd.s32 1, %s666_s16  ;;  %s40_s21 = sadd.s32 1, %s658_s14 }
   0x8   : > { %p33_p0 = scmp.ge.s32.totalorder %s31_s20, 2  ;;  %p47_p1 = scmp.ne.s32.totalorder %s658_s14, %s654_s13 }
   0x9   : > { %p48_p2 = scmp.eq.s32.totalorder %s670_s17, 0  ;;  %p53_p3 = scmp.ne.s32.totalorder %s654_s13, %s650_s12 }
   0xa   : > { %s851_s20 = smov (%p33_p0, %s31_s20), 0  ;;  %p54_p5 = scmp.eq.s32.totalorder %s462_s18, 0 }
   0xb   : > { %p737_p4 = por %p48_p2, %p47_p1  ;;  %s35_s23 = ssub.s32 %s666_s16, %s851_s20 }
   0xc   : > { %p121_p6 = scmp.eq.s32.totalorder %s462_s18, 1  ;;  %p38_p7 = scmp.eq.s32.totalorder %s35_s23, 0 }
   0xd   : > { %p743_p8 = por %p54_p5, %p53_p3  ;;  %p127_p10 = scmp.eq.s32.totalorder %s463_s19, 1 }
   0xe   : > { %p747_p9 = por %p121_p6, %p47_p1  ;;  %p465_p12 = scmp.ge.s32.totalorder %s670_s17, 2 }
   0xf   : > { %s752_s26 = scalar_select %p38_p7, %s658_s14, %s40_s21  }
  0x10   : > { %p754_p11 = por %p127_p10, %p53_p3  ;;  %p491_p13 = scmp.lt.s32.totalorder %s670_s17, 2 }
  0x11   : > { %s153_s28 = sand.u32 1, %s658_s14   ;;  %s477_s30 = sshll.u32 %s666_s16, 3 }
  0x12   : > { %s466_s29 = sshll.u32 %s153_s28, 3  ;;  %s164_s6 = scalar_lea.hbm %s837_s0, %s477_s30 }
  0x13   : > { %s157_s7 = scalar_lea.vmem [#allocation2], %s466_s29  ;;  %s166_s9 = sshll.u32 %s164_s6, 4  ;;  %s167_s9 = int_to_ptr.hbm [resolvable:$true] %s166_s9 }
  0x14   : > { %s168_s8 = sshll.u32 %s157_s7, 4  ;;  %p484_p0 = pnand %p491_p13, %p737_p4  ;;  %s169_s8 = int_to_ptr.vmem [resolvable:$true] %s168_s8 }
  0x15   : > { %p469_p1 = scmp.ge.s32.totalorder %s670_s17, 1  ;;  %p173_p2 = scmp.lt.s32.totalorder %s670_s17, 3 }
  0x16   : > { %s154_s10 = scalar_lea.sflag [#allocation3], %s153_s28 }
  0x17   : > { %486 = dma.hbm_to_vmem [thread:$0]  (!%p484_p0), %s167_s9, 128, %s169_s8, %s154_s10  }
  0x18   : > { %p174_p3 = pnand %p469_p1, %p173_p2 }
  0x19   : > { %s770_s11 = sand.u32 (!%p174_p3), 1, %s654_s13  }
  0x1a   : > { %177 = sbr.rel (%p174_p3) target bundleno = 164 (0xa4), region = 32  ;;  %s470_s18 = sshll.u32 (!%p174_p3), %s770_s11, 3 }
  0x1b   : > { %s180_s19 = scalar_lea.sflag (!%p174_p3), [#allocation3], %s770_s11  ;;  %s183_s21 = scalar_lea.vmem (!%p174_p3), [#allocation2], %s470_s18 }
  0x1f   : > { %641 = dma.done.wait (%p743_p8), %s180_s19, 128  }
  0x20   : > { %643 = vsyncadd (%p743_p8), %s180_s19, 4294967168  ;;  %v672_v0 = vmov 0   ;;  %v673_v1 = vmov 4.0   ;;  %v336_v3 = vld [vmem:[%s838_s1] sm:$0xf]  ;;  %v209_v4 = vld [vmem:[%s183_s21] sm:$0xff] }
  0x21   : > { %545 = vset.pattern.permute.xlu0 %v672_v0  ;;  %546 = vrcp.f32 %v673_v1  ;;  %211 = vst [vmem:[#allocation1] ss:$2 sm:$0xff] %v209_v4  ;;  %v337_v6 = vld [vmem:[%s839_s2] sm:$0xf]  ;;  %vm216_vm0 = vcmask 1043456   ;;  %v674_v29 = vmov 3.0  }
  0x22   : > { %340 = vperm.xlu0 %545, %v336_v3   ;;  %548 = vrcp.f32 %v674_v29  ;;  %s478_s24 = sshll.u32 %s662_s15, 3  ;;  %s206_s6 = scalar_lea.vmem [#allocation5], %s470_s18 }
  0x23   : > { %s373_s5 = scalar_lea.hbm %s840_s3, %s478_s24  ;;  %s375_s7 = sshll.u32 %s206_s6, 4  ;;  %s376_s7 = int_to_ptr.vmem [resolvable:$true] %s375_s7 }
  0x24   : > { %s377_s8 = sshll.u32 %s373_s5, 4  ;;  %s360_s15 = scalar_lea.sflag [#allocation4], %s770_s11  ;;  %s378_s8 = int_to_ptr.hbm [resolvable:$true] %s377_s8 }
  0x25   : > { %s602_s9 = sshra.s32 %s378_s8, 4  ;;  %s608_s18 = scalar_lea.hbm %s840_s3, 16  ;;  %s603_s9 = int_to_ptr.hbm [resolvable:$true] %s602_s9 }
  0x26   : > { %s604_s10 = scalar_lea.hbm %s603_s9, 8  ;;  %p609_p7 = scmp.lt.s32.totalorder %s603_s9, %s840_s3 }
  0x27   : > { %v547_v2 = vpop.eup %546  ;;  %p605_p4 = scmp.ne.s32.totalorder %s603_s9, %s604_s10  ;;  %p610_p8 = scmp.lt.s32.totalorder %s608_s18, %s604_s10 }
  0x28   : > { %v232_v5 = vmul.f32 4.0, %v547_v2  ;;  %v212_v8 = vld.sshfl [vmem:[#allocation1] sm:$0xff pattern:$0x75316420]  ;;  %vm236_vm1 = vweird.f32 %v547_v2  ;;  %v549_v34 = vpop.eup %548 }
  0x29   : > { %v213_v9 = vld.sshfl [vmem:[#allocation1 + $0x8] sm:$0xff pattern:$0x75316420]  ;;  %v217_v10 = vsel %vm216_vm0, %v212_v8, 0.0  ;;  %v268_v35 = vmul.f32 3.0, %v549_v34  ;;  %vm272_vm2 = vweird.f32 %v549_v34  ;;  %p606_p5 = pnand %p605_p4, %p747_p9  ;;  %p611_p10 = por %p610_p8, %p609_p7 }
  0x2a   : > { %v233_v7 = vsub.f32 1.0, %v232_v5  ;;  %350 = vperm.xlu0 %545, %v337_v6   ;;  %v224_v11 = vsel %vm216_vm0, %v213_v9, 0.0  ;;  %v218_v12 = vrot.slane %v217_v10, 4 }
  0x2b   : > { %v225_v13 = vrot.slane %v224_v11, 4  ;;  %v269_v36 = vsub.f32 1.0, %v268_v35  ;;  %p607_p6 = pneg %p606_p5 }
  0x2c   : > { %v234_v14 = vmul.f32 %v547_v2, %v233_v7  ;;  %v219_v15 = vadd.f32 %v218_v12, %v217_v10 }
  0x2d   : > { %v226_v16 = vadd.f32 %v225_v13, %v224_v11  ;;  %v270_v43 = vmul.f32 %v549_v34, %v269_v36  ;;  %v675_v36 = vmov 839922192   ;;  %p612_p13 = pnand %p611_p10, %p607_p6 }
  0x2e   : > { %v220_v17 = vrot.slane %v219_v15, 2  ;;  %v235_v19 = vadd.f32 %v547_v2, %v234_v14 }
  0x2f   : > { %v227_v18 = vrot.slane %v226_v16, 2  ;;  %v271_v48 = vadd.f32 %v549_v34, %v270_v43 }
  0x30   : > { %v221_v20 = vadd.f32 %v220_v17, %v219_v15  ;;  %v237_v24 = vsel %vm236_vm1, %v547_v2, %v235_v19 }
  0x31   : > { %v228_v21 = vadd.f32 %v227_v18, %v226_v16  ;;  %v273_v53 = vsel %vm272_vm2, %v549_v34, %v271_v48 }
  0x32   : > { %v222_v22 = vrot.slane %v221_v20, 1 }
  0x33   : > { %v229_v23 = vrot.slane %v228_v21, 1 }
  0x34   : > { %v223_v25 = vadd.f32 %v222_v22, %v221_v20 }
  0x35   : > { %v230_v26 = vadd.f32 %v229_v23, %v228_v21 }
  0x36   : > { %v238_v27 = vmul.f32 %v237_v24, %v223_v25 }
  0x37   : > { %v239_v28 = vmul.f32 %v237_v24, %v230_v26 }
  0x39   : > { %v242_v30 = vrot.slane %v239_v28, 4 }
  0x3b   : > { %v243_v31 = vsel %vm216_vm0, %v238_v27, %v242_v30 }
  0x3c   : > { %v789_v32 = vsub.f32 %v209_v4, %v243_v31 }
  0x3e   : > { %v246_v33 = vmul.f32 %v789_v32, %v789_v32 }
  0x40   : > { %248 = vst [vmem:[#allocation1] ss:$2 sm:$0xff] %v246_v33 }
  0x47   : > { %v249_v37 = vld.sshfl [vmem:[#allocation1] sm:$0xff pattern:$0x75316420]  ;;  %v250_v38 = vld.sshfl [vmem:[#allocation1 + $0x8] sm:$0xff pattern:$0x75316420] }
  0x48   : > { %v253_v39 = vsel %vm216_vm0, %v249_v37, 0.0  ;;  %v260_v40 = vsel %vm216_vm0, %v250_v38, 0.0  ;;  %v343_v37 = vunpack.c.l.s4 %v675_v36 }
  0x49   : > { %v254_v41 = vrot.slane %v253_v39, 4  ;;  %v261_v42 = vrot.slane %v260_v40, 4 }
  0x4b   : > { %v255_v44 = vadd.f32 %v254_v41, %v253_v39  ;;  %v262_v45 = vadd.f32 %v261_v42, %v260_v40  ;;  %v344_v41 = vunpack.c.0.s8 %v343_v37 }
  0x4d   : > { %v256_v46 = vrot.slane %v255_v44, 2  ;;  %v263_v47 = vrot.slane %v262_v45, 2 }
  0x4f   : > { %v257_v49 = vadd.f32 %v256_v46, %v255_v44  ;;  %v264_v50 = vadd.f32 %v263_v47, %v262_v45 }
  0x51   : > { %v258_v51 = vrot.slane %v257_v49, 1  ;;  %v265_v52 = vrot.slane %v264_v50, 1 }
  0x53   : > { %v259_v54 = vadd.f32 %v258_v51, %v257_v49  ;;  %v266_v55 = vadd.f32 %v265_v52, %v264_v50 }
  0x55   : > { %v274_v56 = vmul.f32 %v273_v53, %v259_v54  ;;  %v275_v57 = vmul.f32 %v273_v53, %v266_v55 }
  0x57   : > { %550 = vrsqrt.f32 %v274_v56  ;;  %vm295_vm3 = vcmp.eq.f32.partialorder %v275_v57, inf  ;;  %v298_v6 = vand.u32 2147483648, %v275_v57  ;;  %vm297_vm4 = vcmp.eq.f32.partialorder %v275_v57, 0.0 }
  0x58   : > { %552 = vrsqrt.f32 %v275_v57  ;;  %vm283_vm5 = vcmp.eq.f32.partialorder %v274_v56, inf  ;;  %v286_v10 = vand.u32 2147483648, %v274_v56  ;;  %vm285_vm6 = vcmp.eq.f32.partialorder %v274_v56, 0.0 }
  0x5d   : > { %v551_v58 = vpop.eup %550 }
  0x5e   : > { %v553_v59 = vpop.eup %552  ;;  %v277_v60 = vmul.f32 %v551_v58, %v274_v56 }
  0x5f   : > { %v289_v61 = vmul.f32 %v553_v59, %v275_v57 }
  0x60   : > { %v278_v62 = vmul.f32 %v551_v58, %v277_v60 }
  0x61   : > { %v290_v63 = vmul.f32 %v553_v59, %v289_v61 }
  0x62   : > { %v279_v0 = vmul.f32 0.5, %v278_v62 }
  0x63   : > { %v291_v1 = vmul.f32 0.5, %v290_v63 }
  0x64   : > { %v280_v2 = vsub.f32 1.5, %v279_v0 }
  0x65   : > { %v292_v3 = vsub.f32 1.5, %v291_v1 }
  0x66   : > { %v281_v4 = vmul.f32 %v551_v58, %v280_v2 }
  0x67   : > { %v293_v5 = vmul.f32 %v553_v59, %v292_v3 }
  0x68   : > { %v282_v7 = vmul.f32 %v281_v4, %v274_v56 }
  0x69   : > { %v294_v8 = vmul.f32 %v293_v5, %v275_v57 }
  0x6a   : > { %v284_v12 = vsel %vm283_vm5, %v274_v56, %v282_v7 }
  0x6b   : > { %v296_v9 = vsel %vm295_vm3, %v275_v57, %v294_v8  ;;  %v287_v14 = vsel %vm285_vm6, %v286_v10, %v284_v12 }
  0x6c   : > { %v299_v11 = vsel %vm297_vm4, %v298_v6, %v296_v9  ;;  %v300_v15 = vadd.f32 1e-05, %v287_v14 }
  0x6d   : > { %v301_v13 = vadd.f32 1e-05, %v299_v11 }
  0x6e   : > { %vm307_vm10 = vweird.f32 %v300_v15  ;;  %v313_v27 = vand.u32 2147483648, %v300_v15  ;;  %v311_v30 = vand.u32 2147483647, %v300_v15 }
  0x6f   : > { %554 = vrcp.f32 %v301_v13  ;;  %vm321_vm7 = vweird.f32 %v301_v13  ;;  %v327_v23 = vand.u32 2147483648, %v301_v13  ;;  %v325_v26 = vand.u32 2147483647, %v301_v13 }
  0x70   : > { %556 = vrcp.f32 %v300_v15  ;;  %v314_v33 = vor.u32 1.1754944e-38, %v313_v27  ;;  %vm312_vm14 = vcmp.eq.f32.partialorder %v311_v30, 8.507059e+37 }
  0x71   : > { %v328_v28 = vor.u32 1.1754944e-38, %v327_v23  ;;  %vm326_vm12 = vcmp.eq.f32.partialorder %v325_v26, 8.507059e+37 }
  0x75   : > { %v555_v16 = vpop.eup %554 }
  0x76   : > { %v317_v17 = vmul.f32 %v555_v16, %v301_v13  ;;  %v557_v18 = vpop.eup %556  ;;  %vm322_vm8 = vweird.f32 %v555_v16 }
  0x77   : > { %v303_v19 = vmul.f32 %v557_v18, %v300_v15  ;;  %vm323_vm9 = vmor %vm321_vm7, %vm322_vm8  ;;  %vm308_vm11 = vweird.f32 %v557_v18 }
  0x78   : > { %v318_v20 = vsub.f32 1.0, %v317_v17  ;;  %vm309_vm13 = vmor %vm307_vm10, %vm308_vm11 }
  0x79   : > { %v304_v21 = vsub.f32 1.0, %v303_v19 }
  0x7a   : > { %v319_v22 = vmul.f32 %v555_v16, %v318_v20 }
  0x7b   : > { %v305_v24 = vmul.f32 %v557_v18, %v304_v21 }
  0x7c   : > { %v320_v25 = vadd.f32 %v555_v16, %v319_v22 }
  0x7d   : > { %v306_v29 = vadd.f32 %v557_v18, %v305_v24 }
  0x7e   : > { %v324_v31 = vsel %vm323_vm9, %v555_v16, %v320_v25 }
  0x7f   : > { %v329_v34 = vsel %vm326_vm12, %v328_v28, %v324_v31  ;;  %v310_v35 = vsel %vm309_vm13, %v557_v18, %v306_v29 }
  0x80   : > { %v332_v38 = vrot.slane %v329_v34, 4  ;;  %v315_v39 = vsel %vm312_vm14, %v314_v33, %v310_v35 }
  0x82   : > { %v333_v42 = vsel %vm216_vm0, %v315_v39, %v332_v38 }
  0x83   : > { %v335_v43 = vmul.f32 %v333_v42, %v789_v32 }
  0x94   : > { %v341_v40 = vpop.permute.xlu0 %340 }
  0x95   : > { %v345_v44 = vperm.slane %v341_v40, %v344_v41 }
  0x97   : > { %v347_v46 = vmul.f32 %v345_v44, %v335_v43 }
  0x9c   : > { %v351_v45 = vpop.permute.xlu0 %350 }
  0x9d   : > { %v355_v47 = vperm.slane %v351_v45, %v344_v41 }
  0x9f   : > { %v357_v48 = vadd.f32 %v355_v47, %v347_v46 }
  0xa1   : > { %358 = vst [vmem:[%s206_s6] sm:$0xff] %v357_v48 }
  0xa2   : > { %615 = shalt.err (!%p612_p13)
}
  0xa3   : > { %481 = dma.vmem_to_hbm [thread:$0]  (%p747_p9), %s376_s7, 128, %s378_s8, %s360_s15  }
  0xa4 PF: > { %s389_s11 = sand.u32 1, %s650_s12   ;;  %p488_p0 = pnand %p465_p12, %p754_p11 }
  0xa5   : > { %s390_s28 = scalar_lea.sflag [#allocation4], %s389_s11 }
  0xa6   : > { %p489_p1 = pneg %p488_p0 }
  0xa8   : > { %645 = dma.done.wait (%p489_p1), %s390_s28, 128  }
  0xa9   : > { %647 = vsyncadd (%p489_p1), %s390_s28, 4294967168  ;;  %s19_s17 = sadd.s32 1, %s670_s17   ;;  %s845_s12 = smov %s654_s13 }
  0xaa   : > { %p16_p2 = scmp.ge.s32.totalorder %s19_s17, 4   ;;  %s846_s13 = smov %s658_s14 }
  0xab   : > { %s847_s14 = smov %s752_s26  ;;  %s848_s15 = smov %s666_s16 }
  0xac   : > { %s849_s16 = smov %s851_s20  ;;  %18 = sbr.rel (!%p16_p2) target bundleno = 6 (0x6), region = 77 }
  0xb1   :  { %396 = vsyncpa [#allocation3], 1 }
  0xb2   :  { %398 = vsyncpa [#allocation3 + $0x1], 1 }
  0xb3   :  { %399 = vsyncpa [#allocation4], 1 }
  0xb4   :  { %401 = vsyncpa [#allocation4 + $0x1], 1 }

</bundles_post_ra>
